<compile_context>
chip_gen: v7x
topology: tpu7x:2x2x1
jax: 0.10.0
libtpu: 0.0.40
codegen_flags: <defaults>
</compile_context>

<pallas_src>
import functools

import jax
import jax.numpy as jnp
from jax.experimental import pallas as pl
from jax.experimental.pallas import tpu as pltpu


# --------------------------------------------------------------------------- #
# Kernels
# --------------------------------------------------------------------------- #
def _layer1_fused_kernel(n_support, cp, a_ref, w1_ref, w2_ref, p_ref):
    """p_stack row-block:  p_ref[i] = (ReLU(A_cat_blk @ W1_cat) @ W2_i).

    Two wide MXU dots with f32 accumulation; the split of pre into per-support
    slabs is S static, 128-lane-aligned slice stores (cheap VMEM copies).
    """
    h = jnp.dot(a_ref[...], w1_ref[...], preferred_element_type=jnp.float32)
    h = jnp.maximum(h, 0.0).astype(jnp.bfloat16)          # ReLU in f32, bf16 operand
    pre = jnp.dot(h, w2_ref[...], preferred_element_type=jnp.float32)
    for i in range(n_support):                            # static unroll (S is tiny)
        p_ref[i, :, :] = pre[:, i * cp:(i + 1) * cp].astype(p_ref.dtype)


def _layer2_kernel(a_ref, p_ref, out_ref):
    """out row-block = A_cat_blk @ p_stack  ==  sum_i A_i_blk @ (h @ W2_i)."""
    out_ref[...] = jnp.dot(a_ref[...], p_ref[...],
                           preferred_element_type=jnp.float32).astype(out_ref.dtype)


# --------------------------------------------------------------------------- #
# Wrapper
# --------------------------------------------------------------------------- #
def _round_up(v, m):
    return ((v + m - 1) // m) * m


def _pad2d(x, rows, cols):
    r, c = x.shape
    return jnp.pad(x, ((0, rows - r), (0, cols - c)))


def gcn_forward(supports, w1_list, w2_list, *, tile_rows=256):
    """Fused GCN forward.

    supports: list of [N, N] adjacency matrices (f32)
    w1_list : list of [N, H]   layer-1 weights  (f32)   (featureless layer)
    w2_list : list of [H, C]   layer-2 weights  (f32)
    Returns [N, C] f32 logits (no activation on layer 2), matching PyTorch.
    """
    s = len(supports)
    n = supports[0].shape[0]
    h_dim = w1_list[0].shape[1]
    c_dim = w2_list[0].shape[1]

    # Hardware-friendly padded sizes: rows multiple of 16 (bf16 sublane pack),
    # lane dims multiple of 128 (unmasked stores, MXU-tile friendly).
    np_ = _round_up(n, 16)
    tm = min(tile_rows, np_)
    np_ = _round_up(np_, tm)
    hp = _round_up(h_dim, 128)          # 200 -> 256
    cp = _round_up(c_dim, 128)          # 10  -> 128

    dt = jnp.bfloat16                   # MXU operand dtype (f32 accumulation)
    a_cat = jnp.concatenate([_pad2d(a, np_, np_) for a in supports],
                            axis=1).astype(dt)               # [Np, S*Np]
    w1_cat = jnp.concatenate([_pad2d(w, np_, hp) for w in w1_list],
                             axis=0).astype(dt)              # [S*Np, Hp]
    w2_cat = jnp.concatenate([_pad2d(w, hp, cp) for w in w2_list],
                             axis=1).astype(dt)              # [Hp, S*Cp]

    grid = (np_ // tm,)
    cparams = pltpu.CompilerParams(dimension_semantics=("parallel",))

    # ---- pass 1: p_stack[i, r, :] = (ReLU(A_cat @ W1_cat) @ W2_i)[r, :] ----
    p3d = pl.pallas_call(
        functools.partial(_layer1_fused_kernel, s, cp),
        out_shape=jax.ShapeDtypeStruct((s, np_, cp), dt),
        grid=grid,
        in_specs=[pl.BlockSpec((tm, s * np_), lambda i: (i, 0)),
                  pl.BlockSpec((s * np_, hp), lambda i: (0, 0)),
                  pl.BlockSpec((hp, s * cp), lambda i: (0, 0))],
        out_specs=pl.BlockSpec((s, tm, cp), lambda i: (0, i, 0)),
        compiler_params=cparams,
    )(a_cat, w1_cat, w2_cat)

    # Contiguous (metadata-only) reshape: [S, Np, Cp] -> [S*Np, Cp].
    p_stack = p3d.reshape(s * np_, cp)

    # ---- pass 2: out = A_cat @ p_stack (one wide dot per row tile) ----
    out_padded = pl.pallas_call(
        _layer2_kernel,
        out_shape=jax.ShapeDtypeStruct((np_, cp), jnp.float32),
        grid=grid,
        in_specs=[pl.BlockSpec((tm, s * np_), lambda i: (i, 0)),
                  pl.BlockSpec((s * np_, cp), lambda i: (0, 0))],
        out_specs=pl.BlockSpec((tm, cp), lambda i: (i, 0)),
        compiler_params=cparams,
    )(a_cat, p_stack)

    # TODO(synk): for very large graphs (S*Np bf16 weights exceeding ~64 MiB VMEM
    # on v7x) add a K-tile grid axis ("arbitrary") with a pl.when-gated f32
    # accumulator instead of keeping W1_cat fully resident.
    return out_padded[:n, :c_dim]


# --------------------------------------------------------------------------- #
# References (pure JAX, no Pallas)
# --------------------------------------------------------------------------- #
def gcn_reference_f32(supports, w1_list, w2_list):
    """High-precision f32 reference mirroring the PyTorch forward exactly."""
    hi = jax.lax.Precision.HIGHEST
    h = None
    for a, w in zip(supports, w1_list):
        t = jnp.dot(a, w, precision=hi)
        h = t if h is None else h + t
    h = jnp.maximum(h, 0.0)
    out = None
    for a, w in zip(supports, w2_list):
        t = jnp.dot(a, jnp.dot(h, w, precision=hi), precision=hi)
        out = t if out is None else out + t
    return out


def gcn_reference_bf16(supports, w1_list, w2_list):
    """Reference that mirrors the kernel's bf16 cast points (wiring check)."""
    hi = jax.lax.Precision.HIGHEST
    bf = lambda x: x.astype(jnp.bfloat16).astype(jnp.float32)
    a_l = [bf(a) for a in supports]
    w1_l = [bf(w) for w in w1_list]
    w2_l = [bf(w) for w in w2_list]
    h = None
    for a, w in zip(a_l, w1_l):
        t = jnp.dot(a, w, precision=hi)
        h = t if h is None else h + t
    h = bf(jnp.maximum(h, 0.0))
    out = None
    for a, w in zip(a_l, w2_l):
        t = jnp.dot(a, bf(jnp.dot(h, w, precision=hi)), precision=hi)
        out = t if out is None else out + t
    return out


# --------------------------------------------------------------------------- #
# Demo
# --------------------------------------------------------------------------- #
if __name__ == "__main__":
    # featureless layer1 requires support[i].shape[1] == input_dim, so N == input_dim.
    N = 16            # number of graph nodes == input_dim
    HIDDEN = 200      # layer-1 output dim (from the module)
    NUM_CLASSES = 10  # layer-2 output dim (default)
    N_SUPPORT = 2     # number of support matrices

    key = jax.random.PRNGKey(0)
    keys = jax.random.split(key, 3 * N_SUPPORT + 1)

    supports = [0.1 * jax.random.normal(keys[i], (N, N), jnp.float32)
                for i in range(N_SUPPORT)]
    w1_list = [jax.random.normal(keys[N_SUPPORT + i], (N, HIDDEN), jnp.float32)
               for i in range(N_SUPPORT)]
    w2_list = [jax.random.normal(keys[2 * N_SUPPORT + i],
                                 (HIDDEN, NUM_CLASSES), jnp.float32)
               for i in range(N_SUPPORT)]

    # x mirrors the PyTorch forward signature but is mathematically unused:
    # layer1 is featureless (ignores x) and dropout_rate=0.0 is the identity.
    x = jax.random.normal(keys[-1], (N, N), jnp.float32)
    del x  # not consumed by the computation

    out = gcn_forward(supports, w1_list, w2_list)
    out = jax.block_until_ready(out)
    assert out.shape == (N, NUM_CLASSES)

    # Tight check against a reference with the same bf16 operand rounding
    # (validates fusion / padding / stacked-layout wiring).
    ref_bf16 = gcn_reference_bf16(supports, w1_list, w2_list)
    assert jnp.allclose(out, ref_bf16, atol=1e-2, rtol=1e-2), \
        "kernel wiring mismatch vs bf16-mirrored reference"

    # Semantic check against the full-precision f32 reference; tolerance sized
    # for bf16 MXU operands (outputs are O(1)-O(5)).
    ref_f32 = gcn_reference_f32(supports, w1_list, w2_list)
    assert jnp.allclose(out, ref_f32, atol=2e-1, rtol=5e-2), \
        "semantic mismatch vs f32 reference"

    print("KERNEL_OK")
</pallas_src>

<mosaic_0001>
module attributes {stable_mosaic.version = 11 : i64} {
  func.func @_layer1_fused_kernel(%arg0: i32, %arg1: memref<16x32xbf16, #tpu.memory_space<vmem>>, %arg2: memref<32x256xbf16, #tpu.memory_space<vmem>>, %arg3: memref<256x256xbf16, #tpu.memory_space<vmem>>, %arg4: memref<2x16x128xbf16, #tpu.memory_space<vmem>>) attributes {dimension_semantics = [#tpu.dimension_semantics<parallel>], iteration_bounds = array<i64: 1>, scalar_prefetch = 0 : i64, scratch_operands = 0 : i64, tpu.core_type = #tpu.core_type<tc>, window_params = [{transform_indices = @transform_0, window_bounds = array<i64: 16, 32>}, {pipeline_mode = #tpu.pipeline_mode<synchronous>, transform_indices = @transform_1, window_bounds = array<i64: 32, 256>}, {pipeline_mode = #tpu.pipeline_mode<synchronous>, transform_indices = @transform_2, window_bounds = array<i64: 256, 256>}, {transform_indices = @transform_3, window_bounds = array<i64: 2, 16, 128>}]} {
    %c0 = arith.constant 0 : index
    %c0_0 = arith.constant 0 : index
    %0 = vector.load %arg1[%c0, %c0_0] : memref<16x32xbf16, #tpu.memory_space<vmem>>, vector<16x32xbf16>
    %c0_1 = arith.constant 0 : index
    %c0_2 = arith.constant 0 : index
    %1 = vector.load %arg2[%c0_1, %c0_2] : memref<32x256xbf16, #tpu.memory_space<vmem>>, vector<32x256xbf16>
    %cst = arith.constant dense<0.000000e+00> : vector<16x256xf32>
    %2 = tpu.matmul %0, %1, %cst {dimension_numbers = #tpu.dot_dimension_numbers<[1], [0], [0], [1], [0, 0, 1, 1], [], []>} : vector<16x32xbf16>, vector<32x256xbf16>, vector<16x256xf32> -> vector<16x256xf32>
    %cst_3 = arith.constant 0.000000e+00 : f32
    %3 = vector.broadcast %cst_3 : f32 to vector<16x256xf32>
    %4 = arith.maximumf %2, %3 : vector<16x256xf32>
    %5 = arith.truncf %4 : vector<16x256xf32> to vector<16x256xbf16>
    %c0_4 = arith.constant 0 : index
    %c0_5 = arith.constant 0 : index
    %6 = vector.load %arg3[%c0_4, %c0_5] : memref<256x256xbf16, #tpu.memory_space<vmem>>, vector<256x256xbf16>
    %cst_6 = arith.constant dense<0.000000e+00> : vector<16x256xf32>
    %7 = tpu.matmul %5, %6, %cst_6 {dimension_numbers = #tpu.dot_dimension_numbers<[1], [0], [0], [1], [0, 0, 1, 1], [], []>} : vector<16x256xbf16>, vector<256x256xbf16>, vector<16x256xf32> -> vector<16x256xf32>
    %8 = vector.extract_strided_slice %7 {offsets = [0, 0], sizes = [16, 128], strides = [1, 1]} : vector<16x256xf32> to vector<16x128xf32>
    %9 = arith.truncf %8 : vector<16x128xf32> to vector<16x128xbf16>
    %c0_7 = arith.constant 0 : index
    %c0_8 = arith.constant 0 : index
    %c0_9 = arith.constant 0 : index
    %10 = vector.load %arg4[%c0_7, %c0_8, %c0_9] : memref<2x16x128xbf16, #tpu.memory_space<vmem>>, vector<1x16x128xbf16>
    %11 = vector.shape_cast %10 : vector<1x16x128xbf16> to vector<16x128xbf16>
    %12 = vector.shape_cast %9 : vector<16x128xbf16> to vector<1x16x128xbf16>
    tpu.vector_store %arg4[%c0_7, %c0_8, %c0_9], %12 {strides = array<i32>} : memref<2x16x128xbf16, #tpu.memory_space<vmem>>, vector<1x16x128xbf16>,
    %13 = vector.extract_strided_slice %7 {offsets = [0, 128], sizes = [16, 128], strides = [1, 1]} : vector<16x256xf32> to vector<16x128xf32>
    %14 = arith.truncf %13 : vector<16x128xf32> to vector<16x128xbf16>
    %c1 = arith.constant 1 : index
    %c0_10 = arith.constant 0 : index
    %c0_11 = arith.constant 0 : index
    %15 = vector.load %arg4[%c1, %c0_10, %c0_11] : memref<2x16x128xbf16, #tpu.memory_space<vmem>>, vector<1x16x128xbf16>
    %16 = vector.shape_cast %15 : vector<1x16x128xbf16> to vector<16x128xbf16>
    %17 = vector.shape_cast %14 : vector<16x128xbf16> to vector<1x16x128xbf16>
    tpu.vector_store %arg4[%c1, %c0_10, %c0_11], %17 {strides = array<i32>} : memref<2x16x128xbf16, #tpu.memory_space<vmem>>, vector<1x16x128xbf16>,
    return
  }
  func.func @transform_0(%arg0: i32) -> (i32, i32) {
    %c0_i32 = arith.constant 0 : i32
    %c0_i32_0 = arith.constant 0 : i32
    return %arg0, %c0_i32 : i32, i32
  }
  func.func @transform_1(%arg0: i32) -> (i32, i32) {
    %c0_i32 = arith.constant 0 : i32
    %c0_i32_0 = arith.constant 0 : i32
    %c0_i32_1 = arith.constant 0 : i32
    return %c0_i32, %c0_i32_0 : i32, i32
  }
  func.func @transform_2(%arg0: i32) -> (i32, i32) {
    %c0_i32 = arith.constant 0 : i32
    %c0_i32_0 = arith.constant 0 : i32
    %c0_i32_1 = arith.constant 0 : i32
    return %c0_i32, %c0_i32_0 : i32, i32
  }
  func.func @transform_3(%arg0: i32) -> (i32, i32, i32) {
    %c0_i32 = arith.constant 0 : i32
    %c0_i32_0 = arith.constant 0 : i32
    %c0_i32_1 = arith.constant 0 : i32
    return %c0_i32, %arg0, %c0_i32_0 : i32, i32, i32
  }
}

</mosaic_0001>

<bundles_post_ra>
// kernel: tpu_custom_call.1
= control target key start
LH: loop header
LB: loop body
LE: loop exit
PB: predicated region body
PF: predicated region fallthrough
CT: control target
= control target key end

     0   :  { %8 = vsyncpa [#allocation3], 0  ;;  %s718_s0 = inlined_call_operand.hbm [shape: bf16[16,32], index: 0, kind: input, shape index: {}]   ;;  %s719_s1 = inlined_call_operand.hbm [shape: bf16[32,256], index: 1, kind: input, shape index: {}]   ;;  %s720_s2 = inlined_call_operand.hbm [shape: bf16[256,256], index: 2, kind: input, shape index: {}]   ;;  %s721_s3 = inlined_call_operand.hbm [shape: bf16[2,16,128], index: 3, kind: output, shape index: {}]  }
   0x1   :  { %9 = vsyncpa [#allocation6], 0 }
   0x2   :  { %10 = vsyncpa [#allocation4], 0  ;;  %s629_s12 = smov [#allocation5]   ;;  %s535_s16 = scalar_lea.hbm %s719_s1, 512 }
   0x3   :  { %s28_s13 = sshll.u32 %s629_s12, 4  ;;  %p536_p0 = scmp.ne.s32.totalorder %s719_s1, %s535_s16  ;;  %s29_s13 = int_to_ptr.vmem [resolvable:$true] %s28_s13 }
   0x4   :  { %p539_p1 = scmp.lt.u32.totalorder %s535_s16, %s719_s1 }
   0x6   :  { %p541_p2 = pnand %p539_p1, %p536_p0 }
   0x8   :  { %544 = shalt.err (!%p541_p2)
}
   0x9   :  { %s545_s21 = scalar_lea.vmem %s29_s13, 512  ;;  %p550_p4 = scmp.lt.s32.totalorder %s29_s13, %s29_s13 }
   0xa   :  { %p546_p3 = scmp.ne.s32.totalorder %s29_s13, %s545_s21  ;;  %p551_p5 = scmp.lt.s32.totalorder %s545_s21, %s545_s21 }
   0xc   :  { %p552_p6 = por %p551_p5, %p550_p4 }
   0xe   :  { %p553_p7 = pnand %p552_p6, %p546_p3 }
  0x10   :  { %556 = shalt.err (!%p553_p7)
}
  0x11   :  { %s630_s22 = smov 128   ;;  %s631_s23 = smov 8  }
  0x12   :  { %34 = dma.hbm_to_vmem [thread:$0]  %s719_s1, 512, %s29_s13, [#allocation6], %s630_s22, %s630_s22, %s631_s23  }
  0x13   :  { %s632_s26 = smov [#allocation2]   ;;  %s557_s30 = scalar_lea.hbm %s718_s0, 128 }
  0x14   :  { %s16_s27 = sshll.u32 %s632_s26, 4  ;;  %p558_p8 = scmp.ne.s32.totalorder %s718_s0, %s557_s30  ;;  %s17_s27 = int_to_ptr.vmem [resolvable:$true] %s16_s27 }
  0x15   :  { %p561_p9 = scmp.lt.u32.totalorder %s557_s30, %s718_s0 }
  0x17   :  { %p563_p10 = pnand %p561_p9, %p558_p8 }
  0x19   :  { %566 = shalt.err (!%p563_p10)
}
  0x1a   :  { %s567_s8 = scalar_lea.vmem %s17_s27, 128  ;;  %p572_p12 = scmp.lt.s32.totalorder %s17_s27, %s17_s27 }
  0x1b   :  { %p568_p11 = scmp.ne.s32.totalorder %s17_s27, %s567_s8  ;;  %p573_p13 = scmp.lt.s32.totalorder %s567_s8, %s567_s8 }
  0x1d   :  { %p574_p0 = por %p573_p13, %p572_p12 }
  0x1f   :  { %p575_p1 = pnand %p574_p0, %p568_p11 }
  0x21   :  { %578 = shalt.err (!%p575_p1)
}
  0x22   :  { %s633_s1 = smov 64   ;;  %s634_s9 = smov 4  }
  0x23   :  { %22 = dma.hbm_to_vmem [thread:$0]  %s718_s0, 128, %s17_s27, [#allocation3], %s633_s1, %s633_s1, %s634_s9  }
  0x24   :  { %s635_s12 = smov [#allocation7]   ;;  %s579_s16 = scalar_lea.hbm %s720_s2, 4096 }
  0x25   :  { %s40_s13 = sshll.u32 %s635_s12, 4  ;;  %p580_p2 = scmp.ne.s32.totalorder %s720_s2, %s579_s16  ;;  %s41_s13 = int_to_ptr.vmem [resolvable:$true] %s40_s13 }
  0x26   :  { %p583_p3 = scmp.lt.u32.totalorder %s579_s16, %s720_s2 }
  0x28   :  { %p585_p4 = pnand %p583_p3, %p580_p2 }
  0x2a   :  { %588 = shalt.err (!%p585_p4)
}
  0x2b   :  { %s589_s21 = scalar_lea.vmem %s41_s13, 4096  ;;  %p594_p6 = scmp.lt.s32.totalorder %s41_s13, %s41_s13 }
  0x2c   :  { %p590_p5 = scmp.ne.s32.totalorder %s41_s13, %s589_s21  ;;  %p595_p7 = scmp.lt.s32.totalorder %s589_s21, %s589_s21 }
  0x2e   :  { %p596_p8 = por %p595_p7, %p594_p6 }
  0x30   :  { %p597_p9 = pnand %p596_p8, %p590_p5 }
  0x32   :  { %600 = shalt.err (!%p597_p9)
}
  0x33   :  { %46 = dma.hbm_to_vmem [thread:$0]  %s720_s2, 4096, %s41_s13, [#allocation6], %s630_s22, %s630_s22, %s631_s23  }
  0x34   :  { %623 = dma.done.wait [#allocation3], 128  }
  0x35   :  { %624 = vsyncadd [#allocation3], 4294967168 }
  0x36   :  { %625 = dma.done.wait [#allocation6], 4608  }
  0x37   :  { %626 = vsyncadd [#allocation6], 4294962688  ;;  %v636_v0 = vmov 0   ;;  %v480_v1 = vld [vmem:[#allocation5 + $0x4] ss:$8 sps:$4 sm:$0xff]   ;;  %v486_v8 = vld [vmem:[#allocation2] sm:$0xff]  }
  0x38   :  { %124 = vmatprep.mubr.bf16.mxu0 %v636_v0  ;;  %v482_v2 = vld [vmem:[#allocation5] ss:$8 sps:$4 sm:$0xff]   ;;  %92 = vmatprep.subr.bf16.mxu0 %v480_v1  ;;  %v483_v3 = vld [vmem:[#allocation5 + $0x14] ss:$8 sps:$4 sm:$0xff]   ;;  %v485_v4 = vld [vmem:[#allocation5 + $0x10] ss:$8 sps:$4 sm:$0xff]  }
  0x39   :  { %93 = vmatpush1.bf16.msra.mxu0 %v482_v2  ;;  %v487_v5 = vld [vmem:[#allocation7 + $0x4] ss:$8 sps:$4 sm:$0xff]   ;;  %v489_v6 = vld [vmem:[#allocation7] ss:$8 sps:$4 sm:$0xff]   ;;  %v490_v7 = vld [vmem:[#allocation7 + $0x14] ss:$8 sps:$4 sm:$0xff]  }
  0x3a   :  { %94 = vmatprep.subr.bf16.mxu0 %v483_v3  ;;  %333 = vmatprep.subr.bf16.mxu1 %v487_v5  ;;  %vm88_vm0 = vcmask 261120   ;;  %v492_v9 = vld [vmem:[#allocation7 + $0x10] ss:$8 sps:$4 sm:$0xff]   ;;  %v493_v10 = vld [vmem:[#allocation7 + $0x24] ss:$8 sps:$4 sm:$0xff]   ;;  %s637_s2 = smov [#allocation8]  }
  0x3b   :  { %334 = vmatpush1.bf16.msra.mxu1 %v489_v6  ;;  %v495_v11 = vld [vmem:[#allocation7 + $0x20] ss:$8 sps:$4 sm:$0xff]   ;;  %v496_v12 = vld [vmem:[#allocation7 + $0x34] ss:$8 sps:$4 sm:$0xff]   ;;  %v498_v13 = vld [vmem:[#allocation7 + $0x30] ss:$8 sps:$4 sm:$0xff]  }
  0x3c   :  { %335 = vmatprep.subr.bf16.mxu1 %v490_v7  ;;  %v499_v14 = vld [vmem:[#allocation7 + $0x44] ss:$8 sps:$4 sm:$0xff]   ;;  %v501_v15 = vld [vmem:[#allocation7 + $0x40] ss:$8 sps:$4 sm:$0xff]   ;;  %v502_v16 = vld [vmem:[#allocation7 + $0x54] ss:$8 sps:$4 sm:$0xff]  }
  0x3d   :  { %95 = vmatpush1.bf16.msra.mxu0 %v485_v4  ;;  %v504_v17 = vld [vmem:[#allocation7 + $0x50] ss:$8 sps:$4 sm:$0xff]   ;;  %v505_v18 = vld [vmem:[#allocation7 + $0x64] ss:$8 sps:$4 sm:$0xff]   ;;  %v507_v19 = vld [vmem:[#allocation7 + $0x60] ss:$8 sps:$4 sm:$0xff]  }
  0x3e   :  { %v508_v20 = vld [vmem:[#allocation7 + $0x74] ss:$8 sps:$4 sm:$0xff]   ;;  %v510_v21 = vld [vmem:[#allocation7 + $0x70] ss:$8 sps:$4 sm:$0xff]   ;;  %v511_v22 = vld [vmem:[#allocation7 + $0x84] ss:$8 sps:$4 sm:$0xff]  }
  0x3f   :  { %336 = vmatpush1.bf16.msra.mxu1 %v492_v9  ;;  %v513_v23 = vld [vmem:[#allocation7 + $0x80] ss:$8 sps:$4 sm:$0xff]   ;;  %v514_v24 = vld [vmem:[#allocation7 + $0x94] ss:$8 sps:$4 sm:$0xff]   ;;  %v516_v25 = vld [vmem:[#allocation7 + $0x90] ss:$8 sps:$4 sm:$0xff]  }
  0x40   :  { %420 = vmatmul.mubr.msk.bf16.vlgmr.msra.gmra.mrb[0].mxu0 %vm88_vm0, %v486_v8  ;;  %337 = vmatprep.subr.bf16.mxu1 %v493_v10  ;;  %v517_v26 = vld [vmem:[#allocation7 + $0xa4] ss:$8 sps:$4 sm:$0xff]   ;;  %v519_v27 = vld [vmem:[#allocation7 + $0xa0] ss:$8 sps:$4 sm:$0xff]   ;;  %v520_v28 = vld [vmem:[#allocation7 + $0xb4] ss:$8 sps:$4 sm:$0xff]  }
  0x41   :  { %v522_v29 = vld [vmem:[#allocation7 + $0xb0] ss:$8 sps:$4 sm:$0xff]   ;;  %v523_v30 = vld [vmem:[#allocation7 + $0xc4] ss:$8 sps:$4 sm:$0xff]   ;;  %v525_v31 = vld [vmem:[#allocation7 + $0xc0] ss:$8 sps:$4 sm:$0xff]  }
  0x42   :  { %v526_v32 = vld [vmem:[#allocation7 + $0xd4] ss:$8 sps:$4 sm:$0xff]   ;;  %v528_v33 = vld [vmem:[#allocation7 + $0xd0] ss:$8 sps:$4 sm:$0xff]   ;;  %v529_v34 = vld [vmem:[#allocation7 + $0xe4] ss:$8 sps:$4 sm:$0xff]  }
  0x43   :  { %338 = vmatpush1.bf16.msra.mxu1 %v495_v11  ;;  %v531_v35 = vld [vmem:[#allocation7 + $0xe0] ss:$8 sps:$4 sm:$0xff]   ;;  %v532_v36 = vld [vmem:[#allocation7 + $0xf4] ss:$8 sps:$4 sm:$0xff]   ;;  %v534_v37 = vld [vmem:[#allocation7 + $0xf0] ss:$8 sps:$4 sm:$0xff]  }
  0x44   :  { %339 = vmatprep.subr.bf16.mxu1 %v496_v12  ;;  %s402_s22 = sshll.u32 %s637_s2, 4  ;;  %s403_s22 = int_to_ptr.vmem [resolvable:$true] %s402_s22 }
  0x45   :  { %s601_s23 = scalar_lea.vmem %s403_s22, 256  ;;  %p606_p11 = scmp.lt.s32.totalorder %s403_s22, %s403_s22 }
  0x46   :  { %p602_p10 = scmp.ne.s32.totalorder %s403_s22, %s601_s23  ;;  %p607_p12 = scmp.lt.s32.totalorder %s601_s23, %s601_s23 }
  0x47   :  { %340 = vmatpush1.bf16.msra.mxu1 %v498_v13 }
  0x48   :  { %341 = vmatprep.subr.bf16.mxu1 %v499_v14  ;;  %p608_p13 = por %p607_p12, %p606_p11 }
  0x4a   :  { %p609_p0 = pnand %p608_p13, %p602_p10 }
  0x4b   :  { %342 = vmatpush1.bf16.msra.mxu1 %v501_v15 }
  0x4c   :  { %343 = vmatprep.subr.bf16.mxu1 %v502_v16 }
  0x4f   :  { %344 = vmatpush1.bf16.msra.mxu1 %v504_v17 }
  0x50   :  { %345 = vmatprep.subr.bf16.mxu1 %v505_v18 }
  0x53   :  { %346 = vmatpush1.bf16.msra.mxu1 %v507_v19 }
  0x54   :  { %347 = vmatprep.subr.bf16.mxu1 %v508_v20 }
  0x57   :  { %348 = vmatpush1.bf16.msra.mxu1 %v510_v21 }
  0x58   :  { %349 = vmatprep.subr.bf16.mxu1 %v511_v22 }
  0x5b   :  { %350 = vmatpush1.bf16.msra.mxu1 %v513_v23 }
  0x5c   :  { %351 = vmatprep.subr.bf16.mxu1 %v514_v24 }
  0x5f   :  { %352 = vmatpush1.bf16.msra.mxu1 %v516_v25 }
  0x60   :  { %353 = vmatprep.subr.bf16.mxu1 %v517_v26 }
  0x63   :  { %354 = vmatpush1.bf16.msra.mxu1 %v519_v27 }
  0x64   :  { %355 = vmatprep.subr.bf16.mxu1 %v520_v28 }
  0x67   :  { %356 = vmatpush1.bf16.msra.mxu1 %v522_v29 }
  0x68   :  { %357 = vmatprep.subr.bf16.mxu1 %v523_v30 }
  0x6b   :  { %358 = vmatpush1.bf16.msra.mxu1 %v525_v31 }
  0x6c   :  { %359 = vmatprep.subr.bf16.mxu1 %v526_v32 }
  0x6f   :  { %360 = vmatpush1.bf16.msra.mxu1 %v528_v33 }
  0x70   :  { %361 = vmatprep.subr.bf16.mxu1 %v529_v34 }
  0x73   :  { %362 = vmatpush1.bf16.msra.mxu1 %v531_v35 }
  0x74   :  { %363 = vmatprep.subr.bf16.mxu1 %v532_v36 }
  0x77   :  { %364 = vmatpush1.bf16.msra.mxu1 %v534_v37 }
 0x113   :  { %v126_v38 = vpop.f32.mrb[0].mxu0 }
 0x114   :  { %v128_v39 = vpop.f32.mrb[1].mxu0  ;;  %v135_v41 = vmax.f32 %v126_v38, 0.0 }
 0x115   :  { %v130_v40 = vpop.f32.mrb[2].mxu0  ;;  %v136_v44 = vmax.f32 %v128_v39, 0.0 }
 0x116   :  { %v137_v42 = vmax.f32 %v130_v40, 0.0  ;;  %v132_v43 = vpop.f32.mrb[3].mxu0 }
 0x117   :  { %v138_v45 = vmax.f32 %v132_v43, 0.0 }
 0x118   :  { %v139_v46 = vpack.c.bf16 %v137_v42, %v135_v41 }
 0x119   :  { %v140_v47 = vpack.c.bf16 %v138_v45, %v136_v44 }
 0x11b   :  { %365 = vmatprep.mubr.bf16.mxu1 %v140_v47 }
 0x11c   :  { %366 = vmatmul.mubr.bf16.vlgmr.msra.gmra.mrb[0].mxu1 %v139_v46 }
 0x1ef   :  { %v367_v48 = vpop.f32.mrb[0].mxu1 }
 0x1f0   :  { %v369_v49 = vpop.f32.mrb[1].mxu1 }
 0x1f1   :  { %v371_v50 = vpop.f32.mrb[2].mxu1 }
 0x1f2   :  { %v464_v51 = vpack.c.bf16 %v371_v50, %v367_v48  ;;  %v373_v52 = vpop.f32.mrb[3].mxu1 }
 0x1f3   :  { %v469_v53 = vpack.c.bf16 %v373_v52, %v369_v49 }
 0x1f4   :  { %465 = vst [vmem:[#allocation8] sm:$0xff] %v464_v51  }
 0x1f5   :  { %470 = vst [vmem:[#allocation8 + $0x8] sm:$0xff] %v469_v53  }
 0x1f6   :  { %612 = shalt.err (!%p609_p0)
}
 0x1f7   :  { %s613_s27 = scalar_lea.hbm %s721_s3, 256 }
 0x1f8   :  { %p614_p1 = scmp.ne.s32.totalorder %s721_s3, %s613_s27  ;;  %p617_p2 = scmp.lt.u32.totalorder %s613_s27, %s721_s3 }
 0x1fa   :  { %p619_p3 = pnand %p617_p2, %p614_p1 }
 0x1fc   :  { %622 = shalt.err (!%p619_p3)
}
 0x1fd   :  { %408 = dma.vmem_to_hbm [thread:$0]  %s403_s22, 256, %s721_s3, [#allocation4], %s633_s1, %s633_s1, %s634_s9  }
 0x1fe   :  { %627 = dma.done.wait [#allocation4], 256  }
 0x1ff   :  { %628 = vsyncadd [#allocation4], 4294967040 }
 0x200   :  { %412 = vsyncpa [#allocation3], 1 }
 0x201   :  { %413 = vsyncpa [#allocation6], 1 }
 0x202   :  { %414 = vsyncpa [#allocation4], 1 }

</bundles_post_ra>
